<compile_context>
chip_gen: v7x
topology: tpu7x:2x2x1
jax: 0.10.0
libtpu: 0.0.40
codegen_flags: <defaults>
</compile_context>

<pallas_src>
import jax
import jax.numpy as jnp
from jax import lax
from jax.experimental import pallas as pl
from jax.experimental.pallas import tpu as pltpu


def _linear_relu_kernel(xa_ref, wa_ref, o_ref):
    # xa_ref: (B, IN+1)  -- activation with a trailing ones column
    # wa_ref: (OUT, IN+1) -- weight with the bias as the trailing column
    # o_ref:  (B, OUT)
    y = lax.dot_general(
        xa_ref[...],
        wa_ref[...],
        dimension_numbers=(((1,), (1,)), ((), ())),  # contract on IN+1 (rhs transposed)
        preferred_element_type=jnp.float32,
    )
    o_ref[...] = jnp.maximum(y, 0.0)


def linear_relu(x, weight, bias):
    """relu(x @ weight.T + bias) via a single grid-free Pallas TPU kernel.

    x: (B, IN) f32, weight: (OUT, IN) f32, bias: (OUT,) f32 -> (B, OUT) f32.
    """
    B, IN = x.shape
    OUT, IN2 = weight.shape
    assert IN == IN2
    K = IN + 1

    # Host-side prep (tiny, done once per call): fold bias into the matmul.
    x_aug = jnp.concatenate([x, jnp.ones((B, 1), dtype=x.dtype)], axis=1)      # (B, IN+1)
    w_aug = jnp.concatenate([weight, bias.reshape(OUT, 1)], axis=1)            # (OUT, IN+1)

    vmem_spec = pl.BlockSpec(memory_space=pltpu.MemorySpace.VMEM)

    cost = pl.CostEstimate(
        flops=2 * B * K * OUT,
        transcendentals=0,
        bytes_accessed=4 * (B * K + OUT * K + B * OUT),
    )

    return pl.pallas_call(
        _linear_relu_kernel,
        out_shape=jax.ShapeDtypeStruct((B, OUT), x.dtype),
        in_specs=[vmem_spec, vmem_spec],
        out_specs=vmem_spec,
        cost_estimate=cost,
    )(x_aug, w_aug)


if __name__ == "__main__":
    key = jax.random.PRNGKey(0)
    kx, kw, kb = jax.random.split(key, 3)

    B, IN, OUT = 8, 8, 4
    x = jax.random.normal(kx, (B, IN), dtype=jnp.float32)
    # Deterministic parameter init (mimics nn.Linear's uniform(-1/sqrt(IN), 1/sqrt(IN)))
    bound = 1.0 / (IN ** 0.5)
    weight = jax.random.uniform(kw, (OUT, IN), minval=-bound, maxval=bound,
                                dtype=jnp.float32)
    bias = jax.random.uniform(kb, (OUT,), minval=-bound, maxval=bound,
                              dtype=jnp.float32)

    out = linear_relu(x, weight, bias)
    jax.block_until_ready(out)

    # Reference check in plain JAX
    ref = jnp.maximum(x @ weight.T + bias, 0.0)
    assert out.shape == (B, OUT)
    assert jnp.allclose(out, ref, atol=1e-5, rtol=1e-5)

    print("KERNEL_OK")
</pallas_src>

<mosaic_0001>
module attributes {stable_mosaic.version = 11 : i64} {
  func.func @_linear_relu_kernel(%arg0: memref<8x9xf32, #tpu.memory_space<vmem>>, %arg1: memref<4x9xf32, #tpu.memory_space<vmem>>, %arg2: memref<8x4xf32, #tpu.memory_space<vmem>>) attributes {dimension_semantics = [], scalar_prefetch = 0 : i64, scratch_operands = 0 : i64, tpu.core_type = #tpu.core_type<tc>} {
    %c0 = arith.constant 0 : index
    %c0_0 = arith.constant 0 : index
    %0 = vector.load %arg0[%c0, %c0_0] : memref<8x9xf32, #tpu.memory_space<vmem>>, vector<8x9xf32>
    %c0_1 = arith.constant 0 : index
    %c0_2 = arith.constant 0 : index
    %1 = vector.load %arg1[%c0_1, %c0_2] : memref<4x9xf32, #tpu.memory_space<vmem>>, vector<4x9xf32>
    %cst = arith.constant dense<0.000000e+00> : vector<8x4xf32>
    %2 = tpu.matmul %0, %1, %cst {dimension_numbers = #tpu.dot_dimension_numbers<[1], [1], [0], [0], [0, 0, 1, 0], [], []>} : vector<8x9xf32>, vector<4x9xf32>, vector<8x4xf32> -> vector<8x4xf32>
    %cst_3 = arith.constant 0.000000e+00 : f32
    %3 = vector.broadcast %cst_3 : f32 to vector<8x4xf32>
    %4 = arith.maximumf %2, %3 : vector<8x4xf32>
    %c0_4 = arith.constant 0 : index
    %c0_5 = arith.constant 0 : index
    %5 = vector.load %arg2[%c0_4, %c0_5] : memref<8x4xf32, #tpu.memory_space<vmem>>, vector<8x4xf32>
    tpu.vector_store %arg2[%c0_4, %c0_5], %4 {strides = array<i32>} : memref<8x4xf32, #tpu.memory_space<vmem>>, vector<8x4xf32>,
    return
  }
}

</mosaic_0001>

<bundles_post_ra>
// kernel: tpu_custom_call.1
= control target key start
LH: loop header
LB: loop body
LE: loop exit
PB: predicated region body
PF: predicated region fallthrough
CT: control target
= control target key end

     0   :  { %7 = vsyncpa [#allocation3], 0  ;;  %s230_s0 = inlined_call_operand.hbm [shape: f32[8,9], index: 0, kind: input, shape index: {}]   ;;  %s231_s1 = inlined_call_operand.hbm [shape: f32[4,9], index: 1, kind: input, shape index: {}]   ;;  %s232_s2 = inlined_call_operand.vmem [shape: f32[8,4], index: 2, kind: output, shape index: {}]  }
   0x1   :  { %8 = vsyncpa [#allocation5], 0  ;;  %s184_s9 = smov [#allocation2]   ;;  %s185_s11 = smov [#allocation4]  }
   0x2   :  { %s15_s10 = sshll.u32 %s184_s9, 4  ;;  %s25_s12 = sshll.u32 %s185_s11, 4  ;;  %s16_s10 = int_to_ptr.vmem [resolvable:$true] %s15_s10  ;;  %s26_s12 = int_to_ptr.vmem [resolvable:$true] %s25_s12 }
   0x3   :  { %s136_s15 = scalar_lea.hbm %s230_s0, 128 }
   0x4   :  { %p137_p0 = scmp.ne.s32.totalorder %s230_s0, %s136_s15  ;;  %p140_p1 = scmp.lt.u32.totalorder %s136_s15, %s230_s0 }
   0x6   :  { %p142_p2 = pnand %p140_p1, %p137_p0 }
   0x8   :  { %145 = shalt.err (!%p142_p2)
}
   0x9   :  { %s146_s20 = scalar_lea.vmem %s16_s10, 128  ;;  %p151_p4 = scmp.lt.s32.totalorder %s16_s10, %s16_s10 }
   0xa   :  { %p147_p3 = scmp.ne.s32.totalorder %s16_s10, %s146_s20  ;;  %p152_p5 = scmp.lt.s32.totalorder %s146_s20, %s146_s20 }
   0xc   :  { %p153_p6 = por %p152_p5, %p151_p4 }
   0xe   :  { %p154_p7 = pnand %p153_p6, %p147_p3 }
  0x10   :  { %157 = shalt.err (!%p154_p7)
}
  0x11   :  { %18 = dma.hbm_to_vmem [thread:$0]  %s230_s0, 128, %s16_s10, [#allocation3]  }
  0x12   :  { %s158_s25 = scalar_lea.hbm %s231_s1, 64 }
  0x13   :  { %p159_p8 = scmp.ne.s32.totalorder %s231_s1, %s158_s25  ;;  %p162_p9 = scmp.lt.u32.totalorder %s158_s25, %s231_s1 }
  0x15   :  { %p164_p10 = pnand %p162_p9, %p159_p8 }
  0x17   :  { %167 = shalt.err (!%p164_p10)
}
  0x18   :  { %s168_s30 = scalar_lea.vmem %s26_s12, 64  ;;  %p173_p12 = scmp.lt.s32.totalorder %s26_s12, %s26_s12 }
  0x19   :  { %p169_p11 = scmp.ne.s32.totalorder %s26_s12, %s168_s30  ;;  %p174_p13 = scmp.lt.s32.totalorder %s168_s30, %s168_s30 }
  0x1b   :  { %p175_p0 = por %p174_p13, %p173_p12 }
  0x1d   :  { %p176_p1 = pnand %p175_p0, %p169_p11 }
  0x1f   :  { %179 = shalt.err (!%p176_p1)
}
  0x20   :  { %28 = dma.hbm_to_vmem [thread:$0]  %s231_s1, 64, %s26_s12, [#allocation5]  }
  0x21   :  { %180 = dma.done.wait [#allocation3], 128  }
  0x22   :  { %181 = vsyncadd [#allocation3], 4294967168 }
  0x23   :  { %182 = dma.done.wait [#allocation5], 64  }
  0x24   :  { %183 = vsyncadd [#allocation5], 4294967232  ;;  %v186_v0 = vmov 0.0   ;;  %vm187_vm0 = vmmov 0   ;;  %vm37_vm1 = vcmask 72704   ;;  %v35_v2 = vld [vmem:[#allocation2] sm:$0xff] }
  0x25   :  { %127 = vmatprep.subr.mxu0 %v186_v0  ;;  %129 = vmatprep.mubr.msk.f32.mxu0 %vm187_vm0, %v186_v0  ;;  %v36_v1 = vld [vmem:[#allocation4] sm:$0xf]  ;;  %vm115_vm2 = vcmask 31744  }
  0x26   :  { %128 = vmatpush3.xpose.msk.msra.mxu0 %vm37_vm1, %v36_v1 }
  0x29   :  { %130 = vmatmul.mubr.msk.f32.vlgmr.msra.gmra.mrb[0].mxu0 %vm37_vm1, %v35_v2 }
  0xfc   :  { %v110_v3 = vpop.f32.mrb[0].mxu0 }
  0xfd   :  { %v114_v4 = vmax.f32 %v110_v3, 0.0  ;;  %v131_v5 = vpop.f32.mrb[1].mxu0 }
  0xff   :  { %116 = vst.msk [vmem:[%s232_s2] sm:$0xff] %vm115_vm2, %v114_v4 }
 0x100   :  { %121 = vsyncpa [#allocation3], 1 }
 0x101   :  { %122 = vsyncpa [#allocation5], 1 }

</bundles_post_ra>
